<compile_context>
chip_gen: v7x
topology: tpu7x:2x2x1
jax: 0.10.0
libtpu: 0.0.40
codegen_flags: <defaults>
</compile_context>

<pallas_src>
import numpy as np
import jax
import jax.numpy as jnp
from jax.experimental import pallas as pl
from jax.experimental.pallas import tpu as pltpu

# ----------------------------------------------------------------------------
# Configuration consistent with the module (forward requires n_mss == sqrt(n_uavs))
# ----------------------------------------------------------------------------
DIM = 2                       # UAV grid side (graph "diameter")
N_UAVS = DIM * DIM            # 4
N_MSS = DIM                   # 2
N_ACTIONS = N_UAVS * N_MSS    # 8
N_OBS = N_MSS * N_UAVS + 4    # 12 : conv-aggregated part + passthrough feats
LAYERS = [32, (32, 32), 32]   # Linear(N_OBS,32)+ReLU, Linear(32,32)+ReLU
BATCH = 200                   # example minibatch


# ----------------------------------------------------------------------------
# Host-side glue: rebuild the non-trainable graph kernel exactly like
# QDuelingGraphNetwork._build_kernel and fold apply_conv into a feature matrix.
# ----------------------------------------------------------------------------
def build_graph_kernel(diameter: int) -> np.ndarray:
    dim = diameter * 2 - 1
    k = np.zeros((dim, dim), dtype=np.float32)
    for i in range(diameter):
        for j in range(i + 1):
            k[i][j] = diameter - j
    aux = k[0:diameter, 0:diameter]
    aux_t_left = aux + aux.T - np.diag(np.diag(aux))
    aux_t_right = np.flip(aux_t_left, axis=1)[:, 1:]
    aux_b_left = np.flip(aux_t_left[0:diameter - 1, 0:diameter], axis=0)
    aux_b_right = np.flip(aux_b_left, axis=1)[:, 1:]
    k[0:diameter, 0:diameter] = aux_t_left
    k[diameter:, 0:diameter] = aux_b_left
    k[0:diameter, diameter:] = aux_t_right
    k[diameter:, diameter:] = aux_b_right
    return k


def build_conv_matrix(k2: np.ndarray, dim: int, n_mss: int, n_uavs: int,
                      n_obs: int) -> np.ndarray:
    """Fold apply_conv (grouped conv2d 'same', transposes, /max_cost) into one
    (n_obs, n_obs) linear map on the feature axis.  Passthrough feats = identity."""
    pad = dim - 1
    a = n_mss * n_uavs
    max_cost = float(n_mss) * float(k2.sum())   # matches the sliced repeated kernel
    p = np.zeros((n_obs, n_obs), dtype=np.float64)
    for m in range(n_mss):          # input ms index (conv W axis)
        for i in range(dim):        # UAV grid row (conv channel / group)
            for j in range(dim):    # UAV grid col (conv H axis)
                idx_in = m * n_uavs + i * dim + j
                for mp in range(n_mss):
                    for jp in range(dim):
                        idx_out = mp * n_uavs + i * dim + jp
                        p[idx_in, idx_out] = (
                            float(k2[j - jp + pad, m - mp + pad]) / max_cost)
    for r in range(a, n_obs):
        p[r, r] = 1.0
    return p


def prepare_params(p_np, w0, b0, w1, b1, wv, bv, wa, ba):
    """Exact algebraic folds (float64), then cast MXU operands to bf16.
       * P folded into W0:  (x@P)@W0 == x@(P@W0)
       * dueling head folded:  value + adv - mean(adv)
             == h @ (wa - mean_cols(wa) + wv) + (ba - mean(ba) + bv)
       Biases stay f32 (epilogue math in f32)."""
    f64 = lambda t: np.asarray(t, np.float64)
    w0e = f64(p_np) @ f64(w0)                                       # (N_OBS, H)
    wh = f64(wa) - f64(wa).mean(axis=1, keepdims=True) + f64(wv)    # (H, A)
    bh = f64(ba) - f64(ba).mean(axis=1, keepdims=True) + f64(bv)    # (1, A)
    return (jnp.asarray(w0e, jnp.bfloat16),
            jnp.asarray(b0, jnp.float32),
            jnp.asarray(w1, jnp.bfloat16),
            jnp.asarray(b1, jnp.float32),
            jnp.asarray(wh, jnp.bfloat16),
            jnp.asarray(bh, jnp.float32))


# ----------------------------------------------------------------------------
# Pallas kernel: one batch tile -> 3 bf16 matmuls (f32 acc) + f32 bias/ReLU
# ----------------------------------------------------------------------------
def qdueling_kernel(x_ref, w0_ref, b0_ref, w1_ref, b1_ref, wh_ref, bh_ref,
                    out_ref):
    x = x_ref[...].astype(jnp.bfloat16)                             # (TB, N_OBS)
    h = jnp.dot(x, w0_ref[...], preferred_element_type=jnp.float32) + b0_ref[...]
    h = jnp.maximum(h, 0.0)
    h = jnp.dot(h.astype(jnp.bfloat16), w1_ref[...],
                preferred_element_type=jnp.float32) + b1_ref[...]
    h = jnp.maximum(h, 0.0)
    # fused dueling head: (TB, N_ACTIONS) f32 store, no padding columns
    out_ref[...] = jnp.dot(h.astype(jnp.bfloat16), wh_ref[...],
                           preferred_element_type=jnp.float32) + bh_ref[...]


def _pick_batch_tile(batch: int) -> int:
    """>=2 grid steps when the batch allows it (v7x: 2 TensorCores), tiles a
    multiple of 128 capped at 2048; tiny batches get one 8-aligned tile."""
    half = -(-batch // 2)                 # ceil(batch / 2)
    tb = -(-half // 128) * 128            # round up to a multiple of 128
    tb = max(128, min(2048, tb))
    if batch < tb:                        # single (possibly masked) tile
        tb = -(-batch // 8) * 8
    return tb


@jax.jit
def qdueling_forward(x, w0e, b0, w1, b1, wh, bh):
    b_in, n_obs = x.shape
    n_act = wh.shape[1]
    tb = _pick_batch_tile(b_in)           # static under jit
    grid = (pl.cdiv(b_in, tb),)           # ragged tail handled by masked block
    return pl.pallas_call(
        qdueling_kernel,
        out_shape=jax.ShapeDtypeStruct((b_in, n_act), jnp.float32),
        grid=grid,
        in_specs=[
            pl.BlockSpec((tb, n_obs), lambda b: (b, 0)),   # activations: tiled over batch
            pl.BlockSpec(w0e.shape, lambda b: (0, 0)),     # weights: resident across steps
            pl.BlockSpec(b0.shape, lambda b: (0, 0)),
            pl.BlockSpec(w1.shape, lambda b: (0, 0)),
            pl.BlockSpec(b1.shape, lambda b: (0, 0)),
            pl.BlockSpec(wh.shape, lambda b: (0, 0)),
            pl.BlockSpec(bh.shape, lambda b: (0, 0)),
        ],
        out_specs=pl.BlockSpec((tb, n_act), lambda b: (b, 0)),
        compiler_params=pltpu.CompilerParams(
            dimension_semantics=("parallel",)),            # v7x: 2 TCs split the batch
    )(x, w0e, b0, w1, b1, wh, bh)


# ----------------------------------------------------------------------------
# float64 numpy reference mirroring the PyTorch forward (conv, MLP, dueling head)
# ----------------------------------------------------------------------------
def reference_forward(x_np, k2, w0, b0, w1, b1, wv, bv, wa, ba):
    B = x_np.shape[0]
    A = N_MSS * N_UAVS
    pad = DIM - 1
    kd = 2 * DIM - 1
    # NCHW with C=DIM (groups==channels), H=DIM, W=N_MSS
    ms = (x_np[:, :A].reshape(B, N_MSS, N_UAVS)
          .transpose(0, 2, 1).reshape(B, DIM, DIM, N_MSS))
    conv = np.zeros_like(ms)
    for jp in range(DIM):            # H
        for mp in range(N_MSS):      # W
            acc = np.zeros((B, DIM), dtype=np.float64)
            for a in range(kd):
                for cc in range(kd):
                    jj = jp + a - pad
                    mm = mp + cc - pad
                    if 0 <= jj < DIM and 0 <= mm < N_MSS:
                        acc = acc + ms[:, :, jj, mm] * k2[a, cc]
            conv[:, :, jp, mp] = acc
    max_cost = float(N_MSS) * float(k2.sum())
    y = conv.reshape(B, N_UAVS, N_MSS).transpose(0, 2, 1).reshape(B, A) / max_cost
    xx = x_np.copy()
    xx[:, :A] = y
    h = np.maximum(xx @ w0 + b0, 0.0)
    h = np.maximum(h @ w1 + b1, 0.0)
    value = h @ wv + bv
    adv = h @ wa + ba
    return value + adv - adv.mean(axis=1, keepdims=True)


# ----------------------------------------------------------------------------
if __name__ == "__main__":
    k2 = build_graph_kernel(DIM)
    p_np = build_conv_matrix(k2, DIM, N_MSS, N_UAVS, N_OBS)

    key = jax.random.PRNGKey(0)
    ks = jax.random.split(key, 9)
    w0 = jax.random.normal(ks[0], (N_OBS, LAYERS[0]), jnp.float32) * 0.1
    b0 = jax.random.normal(ks[1], (1, LAYERS[0]), jnp.float32) * 0.1
    w1 = jax.random.normal(ks[2], (LAYERS[1][0], LAYERS[1][1]), jnp.float32) * 0.1
    b1 = jax.random.normal(ks[3], (1, LAYERS[1][1]), jnp.float32) * 0.1
    wv = jax.random.normal(ks[4], (LAYERS[-1], 1), jnp.float32) * 0.1
    bv = jax.random.normal(ks[5], (1, 1), jnp.float32) * 0.1
    wa = jax.random.normal(ks[6], (LAYERS[-1], N_ACTIONS), jnp.float32) * 0.1
    ba = jax.random.normal(ks[7], (1, N_ACTIONS), jnp.float32) * 0.1
    x = jax.random.normal(ks[8], (BATCH, N_OBS), jnp.float32)

    params = prepare_params(p_np, w0, b0, w1, b1, wv, bv, wa, ba)
    out = qdueling_forward(x, *params)
    out = jax.block_until_ready(out)

    # Reference uses the bf16-quantized input (the kernel quantizes in-kernel);
    # everything else in the reference is float64 PyTorch-equivalent math.
    to64 = lambda t: np.asarray(jnp.asarray(t, jnp.float32), np.float64)
    x_q = to64(x.astype(jnp.bfloat16))
    ref = reference_forward(x_q, np.asarray(k2, np.float64),
                            to64(w0), to64(b0), to64(w1), to64(b1),
                            to64(wv), to64(bv), to64(wa), to64(ba))

    out_np = np.asarray(out, np.float64)
    assert out.shape == (BATCH, N_ACTIONS)
    # tolerance covers bf16 operand quantization; the host-side folds are exact
    assert np.allclose(out_np, ref, rtol=2e-2, atol=2e-2), \
        float(np.max(np.abs(out_np - ref)))
    print("KERNEL_OK")
</pallas_src>

<mosaic_0001>
module attributes {stable_mosaic.version = 11 : i64} {
  func.func @qdueling_kernel(%arg0: i32, %arg1: memref<128x12xf32, #tpu.memory_space<vmem>>, %arg2: memref<12x32xbf16, #tpu.memory_space<vmem>>, %arg3: memref<1x32xf32, #tpu.memory_space<vmem>>, %arg4: memref<32x32xbf16, #tpu.memory_space<vmem>>, %arg5: memref<1x32xf32, #tpu.memory_space<vmem>>, %arg6: memref<32x8xbf16, #tpu.memory_space<vmem>>, %arg7: memref<1x8xf32, #tpu.memory_space<vmem>>, %arg8: memref<128x8xf32, #tpu.memory_space<vmem>>) attributes {dimension_semantics = [#tpu.dimension_semantics<parallel>], iteration_bounds = array<i64: 2>, scalar_prefetch = 0 : i64, scratch_operands = 0 : i64, tpu.core_type = #tpu.core_type<tc>, window_params = [{transform_indices = @transform_0, window_bounds = array<i64: 128, 12>}, {pipeline_mode = #tpu.pipeline_mode<synchronous>, transform_indices = @transform_1, window_bounds = array<i64: 12, 32>}, {pipeline_mode = #tpu.pipeline_mode<synchronous>, transform_indices = @transform_2, window_bounds = array<i64: 1, 32>}, {pipeline_mode = #tpu.pipeline_mode<synchronous>, transform_indices = @transform_3, window_bounds = array<i64: 32, 32>}, {pipeline_mode = #tpu.pipeline_mode<synchronous>, transform_indices = @transform_4, window_bounds = array<i64: 1, 32>}, {pipeline_mode = #tpu.pipeline_mode<synchronous>, transform_indices = @transform_5, window_bounds = array<i64: 32, 8>}, {pipeline_mode = #tpu.pipeline_mode<synchronous>, transform_indices = @transform_6, window_bounds = array<i64: 1, 8>}, {transform_indices = @transform_7, window_bounds = array<i64: 128, 8>}]} {
    %c0 = arith.constant 0 : index
    %c0_0 = arith.constant 0 : index
    %0 = vector.load %arg1[%c0, %c0_0] : memref<128x12xf32, #tpu.memory_space<vmem>>, vector<128x12xf32>
    %1 = arith.truncf %0 : vector<128x12xf32> to vector<128x12xbf16>
    %c0_1 = arith.constant 0 : index
    %c0_2 = arith.constant 0 : index
    %2 = vector.load %arg2[%c0_1, %c0_2] : memref<12x32xbf16, #tpu.memory_space<vmem>>, vector<12x32xbf16>
    %cst = arith.constant dense<0.000000e+00> : vector<128x32xf32>
    %3 = tpu.matmul %1, %2, %cst {dimension_numbers = #tpu.dot_dimension_numbers<[1], [0], [0], [1], [0, 0, 1, 1], [], []>} : vector<128x12xbf16>, vector<12x32xbf16>, vector<128x32xf32> -> vector<128x32xf32>
    %c0_3 = arith.constant 0 : index
    %c0_4 = arith.constant 0 : index
    %4 = vector.load %arg3[%c0_3, %c0_4] : memref<1x32xf32, #tpu.memory_space<vmem>>, vector<1x32xf32>
    %5 = vector.broadcast %4 : vector<1x32xf32> to vector<128x32xf32>
    %6 = arith.addf %3, %5 : vector<128x32xf32>
    %cst_5 = arith.constant 0.000000e+00 : f32
    %7 = vector.broadcast %cst_5 : f32 to vector<128x32xf32>
    %8 = arith.maximumf %6, %7 : vector<128x32xf32>
    %9 = arith.truncf %8 : vector<128x32xf32> to vector<128x32xbf16>
    %c0_6 = arith.constant 0 : index
    %c0_7 = arith.constant 0 : index
    %10 = vector.load %arg4[%c0_6, %c0_7] : memref<32x32xbf16, #tpu.memory_space<vmem>>, vector<32x32xbf16>
    %cst_8 = arith.constant dense<0.000000e+00> : vector<128x32xf32>
    %11 = tpu.matmul %9, %10, %cst_8 {dimension_numbers = #tpu.dot_dimension_numbers<[1], [0], [0], [1], [0, 0, 1, 1], [], []>} : vector<128x32xbf16>, vector<32x32xbf16>, vector<128x32xf32> -> vector<128x32xf32>
    %c0_9 = arith.constant 0 : index
    %c0_10 = arith.constant 0 : index
    %12 = vector.load %arg5[%c0_9, %c0_10] : memref<1x32xf32, #tpu.memory_space<vmem>>, vector<1x32xf32>
    %13 = vector.broadcast %12 : vector<1x32xf32> to vector<128x32xf32>
    %14 = arith.addf %11, %13 : vector<128x32xf32>
    %cst_11 = arith.constant 0.000000e+00 : f32
    %15 = vector.broadcast %cst_11 : f32 to vector<128x32xf32>
    %16 = arith.maximumf %14, %15 : vector<128x32xf32>
    %17 = arith.truncf %16 : vector<128x32xf32> to vector<128x32xbf16>
    %c0_12 = arith.constant 0 : index
    %c0_13 = arith.constant 0 : index
    %18 = vector.load %arg6[%c0_12, %c0_13] : memref<32x8xbf16, #tpu.memory_space<vmem>>, vector<32x8xbf16>
    %cst_14 = arith.constant dense<0.000000e+00> : vector<128x8xf32>
    %19 = tpu.matmul %17, %18, %cst_14 {dimension_numbers = #tpu.dot_dimension_numbers<[1], [0], [0], [1], [0, 0, 1, 1], [], []>} : vector<128x32xbf16>, vector<32x8xbf16>, vector<128x8xf32> -> vector<128x8xf32>
    %c0_15 = arith.constant 0 : index
    %c0_16 = arith.constant 0 : index
    %20 = vector.load %arg7[%c0_15, %c0_16] : memref<1x8xf32, #tpu.memory_space<vmem>>, vector<1x8xf32>
    %21 = vector.broadcast %20 : vector<1x8xf32> to vector<128x8xf32>
    %22 = arith.addf %19, %21 : vector<128x8xf32>
    %c0_17 = arith.constant 0 : index
    %c0_18 = arith.constant 0 : index
    %23 = vector.load %arg8[%c0_17, %c0_18] : memref<128x8xf32, #tpu.memory_space<vmem>>, vector<128x8xf32>
    tpu.vector_store %arg8[%c0_17, %c0_18], %22 {strides = array<i32>} : memref<128x8xf32, #tpu.memory_space<vmem>>, vector<128x8xf32>,
    return
  }
  func.func @transform_0(%arg0: i32) -> (i32, i32) {
    %c0_i32 = arith.constant 0 : i32
    %c0_i32_0 = arith.constant 0 : i32
    return %arg0, %c0_i32 : i32, i32
  }
  func.func @transform_1(%arg0: i32) -> (i32, i32) {
    %c0_i32 = arith.constant 0 : i32
    %c0_i32_0 = arith.constant 0 : i32
    %c0_i32_1 = arith.constant 0 : i32
    return %c0_i32, %c0_i32_0 : i32, i32
  }
  func.func @transform_2(%arg0: i32) -> (i32, i32) {
    %c0_i32 = arith.constant 0 : i32
    %c0_i32_0 = arith.constant 0 : i32
    %c0_i32_1 = arith.constant 0 : i32
    return %c0_i32, %c0_i32_0 : i32, i32
  }
  func.func @transform_3(%arg0: i32) -> (i32, i32) {
    %c0_i32 = arith.constant 0 : i32
    %c0_i32_0 = arith.constant 0 : i32
    %c0_i32_1 = arith.constant 0 : i32
    return %c0_i32, %c0_i32_0 : i32, i32
  }
  func.func @transform_4(%arg0: i32) -> (i32, i32) {
    %c0_i32 = arith.constant 0 : i32
    %c0_i32_0 = arith.constant 0 : i32
    %c0_i32_1 = arith.constant 0 : i32
    return %c0_i32, %c0_i32_0 : i32, i32
  }
  func.func @transform_5(%arg0: i32) -> (i32, i32) {
    %c0_i32 = arith.constant 0 : i32
    %c0_i32_0 = arith.constant 0 : i32
    %c0_i32_1 = arith.constant 0 : i32
    return %c0_i32, %c0_i32_0 : i32, i32
  }
  func.func @transform_6(%arg0: i32) -> (i32, i32) {
    %c0_i32 = arith.constant 0 : i32
    %c0_i32_0 = arith.constant 0 : i32
    %c0_i32_1 = arith.constant 0 : i32
    return %c0_i32, %c0_i32_0 : i32, i32
  }
  func.func @transform_7(%arg0: i32) -> (i32, i32) {
    %c0_i32 = arith.constant 0 : i32
    %c0_i32_0 = arith.constant 0 : i32
    return %arg0, %c0_i32 : i32, i32
  }
}

</mosaic_0001>

<bundles_post_ra>
// kernel: qdueling_forward.1
= control target key start
LH: loop header
LB: loop body
LE: loop exit
PB: predicated region body
PF: predicated region fallthrough
CT: control target
= control target key end

     0   :  { %s1465_s24 = smov 0   ;;  %s1467_s25 = smov 0   ;;  %s1685_s0 = inlined_call_operand.vmem [shape: f32[200,12], index: 0, kind: input, shape index: {}]   ;;  %s1686_s1 = inlined_call_operand.vmem [shape: bf16[12,32], index: 1, kind: input, shape index: {}]   ;;  %s1687_s2 = inlined_call_operand.vmem [shape: f32[1,32], index: 2, kind: input, shape index: {}]   ;;  %s1688_s3 = inlined_call_operand.vmem [shape: bf16[32,32], index: 3, kind: input, shape index: {}]   ;;  %s1689_s4 = inlined_call_operand.vmem [shape: f32[1,32], index: 4, kind: input, shape index: {}]   ;;  %s1690_s5 = inlined_call_operand.vmem [shape: bf16[32,8], index: 5, kind: input, shape index: {}]   ;;  %s1691_s6 = inlined_call_operand.vmem [shape: f32[1,8], index: 6, kind: input, shape index: {}]   ;;  %s1692_s7 = inlined_call_operand.vmem [shape: f32[200,8], index: 7, kind: output, shape index: {}]  }
   0x1   :  { %s1469_s26 = smov 0  }
   0x2 LB: > { %s1478_s27 = sadd.s32 4294967295, %s1391_s26   ;;  %s1480_s28 = sadd.s32 1, %s1391_s26   ;;  %s1391_s26 = sphi %s1469_s26, %s1699_s26   ;;  %s1387_s25 = sphi %s1467_s25, %s1698_s25   ;;  %s1383_s24 = sphi %s1465_s24, %s1697_s24  }
   0x3   : > { %s173_s29 = ssub.s32 %s1391_s26, %s1480_s28  ;;  %s176_s30 = sadd.s32 1, %s1387_s25 }
   0x4   : > { %p174_p0 = scmp.eq.s32.totalorder %s173_s29, 0  ;;  %p186_p1 = scmp.ne.s32.totalorder %s1387_s25, %s1383_s24 }
   0x5   : > { %p187_p2 = scmp.eq.s32.totalorder %s1478_s27, 1  ;;  %p1097_p3 = scmp.ge.s32.totalorder %s1391_s26, 1 }
   0x6   : > { %s1488_s8 = scalar_select %p174_p0, %s1387_s25, %s176_s30  }
   0x7   : > { %p1490_p4 = por %p187_p2, %p186_p1  ;;  %p246_p5 = scmp.lt.s32.totalorder %s1391_s26, 3 }
   0x9   : > { %p247_p6 = pnand %p1097_p3, %p246_p5 }
   0xa   : > { %v1332_v0 = vld [vmem:[%s1686_s1] sm:$0x3f] (!%p247_p6)   ;;  %vm364_vm0 = vcmask (!%p247_p6), 1045504   ;;  %s1498_s12 = sshll.u32 (!%p247_p6), %s1478_s27, 4  ;;  %vm339_vm1 = vcmask (!%p247_p6), 97280   ;;  %v1334_v27 = vld [vmem:[%s1688_s3 + $0x8] sm:$0xff] (!%p247_p6)  }
   0xb   : > { %250 = sbr.rel (%p247_p6) target bundleno = 761 (0x2f9), region = 48  ;;  %v1333_v1 = vld [vmem:[%s1688_s3] sm:$0xff] (!%p247_p6)   ;;  %1242 = vmatprep.subr.msk.bf16.mxu0 (!%p247_p6), %vm364_vm0, %v1332_v0  ;;  %v366_v2 = vsel (!%p247_p6), %vm364_vm0, %v1332_v0, 0  ;;  %p286_p7 = scmp.lt.s32.totalorder (!%p247_p6), %s1498_s12, 24  ;;  %1243 = vmatprep.subr.msk.bf16.mxu1 (!%p247_p6), %vm364_vm0, %v1332_v0  ;;  %vm512_vm2 = vcmask (!%p247_p6), 261120   ;;  %vm802_vm3 = vcmask (!%p247_p6), 64512  }
   0xc   : > { %1183 = vmatpush3.bf16.msra.mxu0 (!%p247_p6), %v366_v2  ;;  %1241 = vmatpush3.bf16.msra.mxu1 (!%p247_p6), %v366_v2  ;;  %v1335_v28 = vld [vmem:[%s1690_s5] sm:$0xff] (!%p247_p6)   ;;  %s278_s14 = sand.u32 (!%p247_p6), 1, %s1383_s24  }
   0xd   : > { %1200 = vmatprep.subr.bf16.mxu1 (!%p247_p6), %v1333_v1  ;;  %1220 = vmatprep.subr.bf16.mxu0 (!%p247_p6), %v1335_v28  ;;  %v1101_v29 = vld [vmem:[%s1687_s2] ss:$0 sm:$0xff] (!%p247_p6) }
  0x12   : > { %s287_s15 = scalar_select %p286_p7, %s1498_s12, 24 }
  0x13   : > { %s827_s24 = ssub.s32 (%p1490_p4), 25, %s1498_s12 }
  0x14   : > { %s1100_s16 = sshll.u32 %s287_s15, 3  ;;  %s1098_s15 = sshll.u32 %s278_s14, 7 }
  0x15   : > { %s289_s19 = scalar_lea.vmem %s1685_s0, %s1100_s16  ;;  %s1551_s18 = scalar_lea.vmem [#allocation2], %s1098_s15  }
  0x16   : > { %v301_v3 = vld [vmem:[%s289_s19] sm:$0xff]  ;;  %v302_v4 = vld [vmem:[%s289_s19 + $0x8] sm:$0xff]  ;;  %v303_v5 = vld [vmem:[%s289_s19 + $0x10] sm:$0xff]  ;;  %p828_p8 = scmp.lt.s32.totalorder (%p1490_p4), %s827_s24, 16 }
  0x17   : > { %v317_v6 = vpack.c.bf16 %v302_v4, %v301_v3  ;;  %v304_v7 = vld [vmem:[%s289_s19 + $0x18] sm:$0xff]  ;;  %v305_v8 = vld [vmem:[%s289_s19 + $0x20] sm:$0xff]  ;;  %v306_v9 = vld [vmem:[%s289_s19 + $0x28] sm:$0xff] }
  0x18   : > { %v318_v10 = vpack.c.bf16 %v304_v7, %v303_v5  ;;  %v319_v11 = vpack.c.bf16 %v306_v9, %v305_v8  ;;  %v309_v12 = vld [vmem:[%s289_s19 + $0x40] sm:$0xff]  ;;  %v310_v13 = vld [vmem:[%s289_s19 + $0x48] sm:$0xff]  ;;  %v311_v14 = vld [vmem:[%s289_s19 + $0x50] sm:$0xff] }
  0x19   : > { %1184 = vmatprep.mubr.msk.bf16.mxu0 %vm339_vm1, %v317_v6  ;;  %v312_v15 = vld [vmem:[%s289_s19 + $0x58] sm:$0xff]  ;;  %v321_v16 = vpack.c.bf16 %v310_v13, %v309_v12  ;;  %v313_v18 = vld [vmem:[%s289_s19 + $0x60] sm:$0xff]  ;;  %v314_v19 = vld [vmem:[%s289_s19 + $0x68] sm:$0xff] }
  0x1a   : > { %1185 = vmatmul.mubr.msk.bf16.vlgmr.msra.gmra.mrb[0].mxu0 %vm339_vm1, %v318_v10  ;;  %v322_v17 = vpack.c.bf16 %v312_v15, %v311_v14  ;;  %v307_v20 = vld [vmem:[%s289_s19 + $0x30] sm:$0xff]  ;;  %v308_v21 = vld [vmem:[%s289_s19 + $0x38] sm:$0xff]  ;;  %v323_v22 = vpack.c.bf16 %v314_v19, %v313_v18 }
  0x1b   : > { %1188 = vmatprep.mubr.msk.bf16.mxu0 %vm339_vm1, %v319_v11  ;;  %1192 = vmatprep.mubr.msk.bf16.mxu1 %vm339_vm1, %v321_v16  ;;  %v320_v23 = vpack.c.bf16 %v308_v21, %v307_v20  ;;  %v315_v24 = vld [vmem:[%s289_s19 + $0x70] sm:$0xff]  ;;  %v316_v25 = vld [vmem:[%s289_s19 + $0x78] sm:$0xff]  ;;  %s1150_s19 = sshll.u32 (%p1490_p4), %s1478_s27, 7 }
  0x1c   : > { %1193 = vmatmul.mubr.msk.bf16.vlgmr.msra.gmra.mrb[0].mxu1 %vm339_vm1, %v322_v17  ;;  %v324_v26 = vpack.c.bf16 %v316_v25, %v315_v24  ;;  %1221 = vmatpush3.bf16.msra.mxu0 %v1335_v28  ;;  %s1592_s22 = scalar_lea.vmem (%p1490_p4), %s1692_s7, %s1150_s19  }
  0x1d   : > { %1196 = vmatprep.mubr.msk.bf16.mxu1 %vm339_vm1, %v323_v22  ;;  %1201 = vmatpush3.bf16.msra.mxu1 %v1333_v1  ;;  %v1336_v22 = vld [vmem:[%s1690_s5 + $0x8] sm:$0xff]  }
  0x1e   : > { %1202 = vmatprep.subr.bf16.mxu1 %v1334_v27  ;;  %1222 = vmatprep.subr.bf16.mxu0 %v1336_v22 }
  0x20   : > { %1223 = vmatpush3.bf16.msra.mxu0 %v1336_v22 }
  0x21   : > { %1203 = vmatpush3.bf16.msra.mxu1 %v1334_v27 }
  0x22   : > { %1189 = vmatmul.mubr.msk.bf16.gmra.mrb[4].mxu0 %vm339_vm1, %v320_v23  ;;  %v1111_v23 = vld [vmem:[%s1689_s4] ss:$0 sm:$0xff] }
  0x24   : > { %1197 = vmatmul.mubr.msk.bf16.gmra.mrb[4].mxu1 %vm339_vm1, %v324_v26 }
  0xed   : > { %v1186_v30 = vpop.f32.mrb[0].mxu0 }
  0xee   : > { %v411_v31 = vadd.f32 %v1186_v30, %v1101_v29  ;;  %v402_v32 = vpop.f32.mrb[1].mxu0 }
  0xef   : > { %v403_v33 = vadd.f32 %v1101_v29, %v402_v32  ;;  %v1187_v34 = vpop.f32.mrb[2].mxu0  ;;  %v1194_v37 = vpop.f32.mrb[0].mxu1 }
  0xf0   : > { %v414_v35 = vadd.f32 %v1187_v34, %v1101_v29  ;;  %v405_v36 = vpop.f32.mrb[3].mxu0  ;;  %v443_v39 = vadd.f32 %v1194_v37, %v1101_v29  ;;  %v434_v40 = vpop.f32.mrb[1].mxu1  ;;  %v467_v41 = vmax.f32 %v411_v31, 0.0 }
  0xf1   : > { %v406_v38 = vadd.f32 %v1101_v29, %v405_v36  ;;  %v435_v43 = vadd.f32 %v1101_v29, %v434_v40  ;;  %v1195_v44 = vpop.f32.mrb[2].mxu1  ;;  %v465_v45 = vmax.f32 %v403_v33, 0.0 }
  0xf2   : > { %v468_v42 = vmax.f32 %v414_v35, 0.0  ;;  %v475_v47 = vmax.f32 %v443_v39, 0.0  ;;  %v446_v48 = vadd.f32 %v1195_v44, %v1101_v29  ;;  %v437_v49 = vpop.f32.mrb[3].mxu1 }
  0xf3   : > { %v466_v46 = vmax.f32 %v406_v38, 0.0  ;;  %v473_v51 = vmax.f32 %v435_v43, 0.0  ;;  %v438_v52 = vadd.f32 %v1101_v29, %v437_v49 }
  0xf4   : > { %v482_v50 = vpack.c.bf16 %v468_v42, %v467_v41  ;;  %v476_v55 = vmax.f32 %v446_v48, 0.0 }
  0xf5   : > { %v481_v53 = vpack.c.bf16 %v466_v46, %v465_v45  ;;  %v1190_v54 = vpop.f32.mrb[4].mxu0  ;;  %v474_v58 = vmax.f32 %v438_v52, 0.0 }
  0xf6   : > { %v427_v56 = vadd.f32 %v1190_v54, %v1101_v29  ;;  %v418_v57 = vpop.f32.mrb[5].mxu0  ;;  %v486_v61 = vpack.c.bf16 %v476_v55, %v475_v47 }
  0xf7   : > { %v419_v59 = vadd.f32 %v1101_v29, %v418_v57  ;;  %v1191_v60 = vpop.f32.mrb[6].mxu0  ;;  %1204 = vmatprep.mubr.msk.bf16.mxu1 %vm512_vm2, %v481_v53  ;;  %v485_v0 = vpack.c.bf16 %v474_v58, %v473_v51  ;;  %v1198_v1 = vpop.f32.mrb[4].mxu1 }
  0xf8   : > { %v430_v62 = vadd.f32 %v1191_v60, %v1101_v29  ;;  %v421_v63 = vpop.f32.mrb[7].mxu0  ;;  %1205 = vmatmul.mubr.msk.bf16.vlgmr.msra.gmra.mrb[8].mxu1 %vm512_vm2, %v482_v50  ;;  %v459_v3 = vadd.f32 %v1198_v1, %v1101_v29  ;;  %v450_v4 = vpop.f32.mrb[5].mxu1  ;;  %v471_v5 = vmax.f32 %v427_v56, 0.0 }
  0xf9   : > { %v422_v2 = vadd.f32 %v1101_v29, %v421_v63  ;;  %v451_v7 = vadd.f32 %v1101_v29, %v450_v4  ;;  %v1199_v8 = vpop.f32.mrb[6].mxu1  ;;  %v469_v9 = vmax.f32 %v419_v59, 0.0 }
  0xfa   : > { %v472_v6 = vmax.f32 %v430_v62, 0.0  ;;  %v479_v11 = vmax.f32 %v459_v3, 0.0  ;;  %v462_v12 = vadd.f32 %v1199_v8, %v1101_v29  ;;  %v453_v13 = vpop.f32.mrb[7].mxu1 }
  0xfb   : > { %v470_v10 = vmax.f32 %v422_v2, 0.0  ;;  %v477_v15 = vmax.f32 %v451_v7, 0.0  ;;  %v454_v16 = vadd.f32 %v1101_v29, %v453_v13 }
  0xfc   : > { %v484_v14 = vpack.c.bf16 %v472_v6, %v471_v5  ;;  %v480_v18 = vmax.f32 %v462_v12, 0.0 }
  0xfd   : > { %v483_v17 = vpack.c.bf16 %v470_v10, %v469_v9  ;;  %v478_v19 = vmax.f32 %v454_v16, 0.0  ;;  %v1122_v16 = vld [vmem:[%s1691_s6] ss:$0 sm:$0xff] }
  0xfe   : > { %v488_v20 = vpack.c.bf16 %v480_v18, %v479_v11 }
  0xff   : > { %1208 = vmatprep.mubr.msk.bf16.mxu1 %vm512_vm2, %v483_v17  ;;  %v487_v21 = vpack.c.bf16 %v478_v19, %v477_v15 }
 0x100   : > { %1209 = vmatmul.mubr.msk.bf16.gmra.mrb[12].mxu1 %vm512_vm2, %v484_v14 }
 0x101   : > { %1212 = vmatprep.mubr.msk.bf16.mxu1 %vm512_vm2, %v485_v0 }
 0x108   : > { %1213 = vmatmul.mubr.msk.bf16.gmra.mrb[16].mxu1 %vm512_vm2, %v486_v61 }
 0x109   : > { %1216 = vmatprep.mubr.msk.bf16.mxu1 %vm512_vm2, %v487_v21 }
 0x110   : > { %1217 = vmatmul.mubr.msk.bf16.gmra.mrb[20].mxu1 %vm512_vm2, %v488_v20 }
 0x1cb   : > { %v1206_v24 = vpop.f32.mrb[8].mxu1 }
 0x1cc   : > { %v580_v25 = vadd.f32 %v1206_v24, %v1111_v23  ;;  %v571_v26 = vpop.f32.mrb[9].mxu1 }
 0x1cd   : > { %v572_v27 = vadd.f32 %v1111_v23, %v571_v26  ;;  %v1207_v28 = vpop.f32.mrb[10].mxu1 }
 0x1ce   : > { %v583_v29 = vadd.f32 %v1207_v28, %v1111_v23  ;;  %v574_v30 = vpop.f32.mrb[11].mxu1  ;;  %v636_v32 = vmax.f32 %v580_v25, 0.0 }
 0x1cf   : > { %v575_v31 = vadd.f32 %v1111_v23, %v574_v30  ;;  %v634_v34 = vmax.f32 %v572_v27, 0.0 }
 0x1d0   : > { %v637_v33 = vmax.f32 %v583_v29, 0.0 }
 0x1d1   : > { %v635_v35 = vmax.f32 %v575_v31, 0.0 }
 0x1d2   : > { %v651_v36 = vpack.c.bf16 %v637_v33, %v636_v32 }
 0x1d3   : > { %v650_v37 = vpack.c.bf16 %v635_v35, %v634_v34  ;;  %v1210_v38 = vpop.f32.mrb[12].mxu1 }
 0x1d4   : > { %v596_v39 = vadd.f32 %v1210_v38, %v1111_v23  ;;  %v587_v40 = vpop.f32.mrb[13].mxu1 }
 0x1d5   : > { %v588_v41 = vadd.f32 %v1111_v23, %v587_v40  ;;  %v1211_v42 = vpop.f32.mrb[14].mxu1  ;;  %1224 = vmatprep.mubr.msk.bf16.mxu0 %vm512_vm2, %v650_v37 }
 0x1d6   : > { %v599_v43 = vadd.f32 %v1211_v42, %v1111_v23  ;;  %v590_v44 = vpop.f32.mrb[15].mxu1  ;;  %1225 = vmatmul.mubr.msk.bf16.vlgmr.msra.gmra.mrb[8].mxu0 %vm512_vm2, %v651_v36  ;;  %v640_v46 = vmax.f32 %v596_v39, 0.0 }
 0x1d7   : > { %v591_v45 = vadd.f32 %v1111_v23, %v590_v44  ;;  %v638_v48 = vmax.f32 %v588_v41, 0.0 }
 0x1d8   : > { %v641_v47 = vmax.f32 %v599_v43, 0.0 }
 0x1d9   : > { %v639_v49 = vmax.f32 %v591_v45, 0.0 }
 0x1da   : > { %v653_v50 = vpack.c.bf16 %v641_v47, %v640_v46 }
 0x1db   : > { %v652_v51 = vpack.c.bf16 %v639_v49, %v638_v48  ;;  %v1214_v52 = vpop.f32.mrb[16].mxu1 }
 0x1dc   : > { %v612_v53 = vadd.f32 %v1214_v52, %v1111_v23  ;;  %v603_v54 = vpop.f32.mrb[17].mxu1 }
 0x1dd   : > { %v604_v55 = vadd.f32 %v1111_v23, %v603_v54  ;;  %v1215_v56 = vpop.f32.mrb[18].mxu1  ;;  %1228 = vmatprep.mubr.msk.bf16.mxu0 %vm512_vm2, %v652_v51 }
 0x1de   : > { %v615_v57 = vadd.f32 %v1215_v56, %v1111_v23  ;;  %v606_v58 = vpop.f32.mrb[19].mxu1  ;;  %1229 = vmatmul.mubr.msk.bf16.gmra.mrb[12].mxu0 %vm512_vm2, %v653_v50  ;;  %v644_v60 = vmax.f32 %v612_v53, 0.0 }
 0x1df   : > { %v607_v59 = vadd.f32 %v1111_v23, %v606_v58  ;;  %v642_v62 = vmax.f32 %v604_v55, 0.0 }
 0x1e0   : > { %v645_v61 = vmax.f32 %v615_v57, 0.0 }
 0x1e1   : > { %v643_v63 = vmax.f32 %v607_v59, 0.0 }
 0x1e2   : > { %v655_v0 = vpack.c.bf16 %v645_v61, %v644_v60 }
 0x1e3   : > { %v654_v1 = vpack.c.bf16 %v643_v63, %v642_v62  ;;  %v1218_v2 = vpop.f32.mrb[20].mxu1 }
 0x1e4   : > { %v628_v3 = vadd.f32 %v1218_v2, %v1111_v23  ;;  %v619_v4 = vpop.f32.mrb[21].mxu1 }
 0x1e5   : > { %v620_v5 = vadd.f32 %v1111_v23, %v619_v4  ;;  %v1219_v6 = vpop.f32.mrb[22].mxu1  ;;  %1232 = vmatprep.mubr.msk.bf16.mxu0 %vm512_vm2, %v654_v1 }
 0x1e6   : > { %v631_v7 = vadd.f32 %v1219_v6, %v1111_v23  ;;  %v622_v8 = vpop.f32.mrb[23].mxu1  ;;  %1233 = vmatmul.mubr.msk.bf16.gmra.mrb[16].mxu0 %vm512_vm2, %v655_v0  ;;  %v648_v10 = vmax.f32 %v628_v3, 0.0 }
 0x1e7   : > { %v623_v9 = vadd.f32 %v1111_v23, %v622_v8  ;;  %v646_v12 = vmax.f32 %v620_v5, 0.0 }
 0x1e8   : > { %v649_v11 = vmax.f32 %v631_v7, 0.0 }
 0x1e9   : > { %v647_v13 = vmax.f32 %v623_v9, 0.0 }
 0x1ea   : > { %v657_v14 = vpack.c.bf16 %v649_v11, %v648_v10 }
 0x1eb   : > { %v656_v15 = vpack.c.bf16 %v647_v13, %v646_v12 }
 0x1ed   : > { %1236 = vmatprep.mubr.msk.bf16.mxu0 %vm512_vm2, %v656_v15 }
 0x1ee   : > { %1237 = vmatmul.mubr.msk.bf16.gmra.mrb[20].mxu0 %vm512_vm2, %v657_v14 }
 0x2a9   : > { %v1226_v17 = vpop.f32.mrb[8].mxu0 }
 0x2aa   : > { %v748_v18 = vadd.f32 %v1226_v17, %v1122_v16  ;;  %v739_v19 = vpop.f32.mrb[9].mxu0 }
 0x2ab   : > { %v740_v20 = vadd.f32 %v1122_v16, %v739_v19  ;;  %v1227_v21 = vpop.f32.mrb[10].mxu0 }
 0x2ac   : > { %805 = vst.msk [vmem:[%s1551_s18 + $0x10] sm:$0xff] %vm802_vm3, %v748_v18  ;;  %v751_v22 = vadd.f32 %v1227_v21, %v1122_v16  ;;  %v742_v23 = vpop.f32.mrb[11].mxu0 }
 0x2ad   : > { %803 = vst.msk [vmem:[%s1551_s18] sm:$0xff] %vm802_vm3, %v740_v20  ;;  %v743_v24 = vadd.f32 %v1122_v16, %v742_v23 }
 0x2ae   : > { %806 = vst.msk [vmem:[%s1551_s18 + $0x18] sm:$0xff] %vm802_vm3, %v751_v22 }
 0x2af   : > { %804 = vst.msk [vmem:[%s1551_s18 + $0x8] sm:$0xff] %vm802_vm3, %v743_v24 }
 0x2b1   : > { %v1230_v25 = vpop.f32.mrb[12].mxu0 }
 0x2b2   : > { %v764_v26 = vadd.f32 %v1230_v25, %v1122_v16  ;;  %v755_v27 = vpop.f32.mrb[13].mxu0 }
 0x2b3   : > { %v756_v28 = vadd.f32 %v1122_v16, %v755_v27  ;;  %v1231_v29 = vpop.f32.mrb[14].mxu0 }
 0x2b4   : > { %809 = vst.msk [vmem:[%s1551_s18 + $0x30] sm:$0xff] %vm802_vm3, %v764_v26  ;;  %v767_v30 = vadd.f32 %v1231_v29, %v1122_v16  ;;  %v758_v31 = vpop.f32.mrb[15].mxu0 }
 0x2b5   : > { %807 = vst.msk [vmem:[%s1551_s18 + $0x20] sm:$0xff] %vm802_vm3, %v756_v28  ;;  %v759_v32 = vadd.f32 %v1122_v16, %v758_v31 }
 0x2b6   : > { %810 = vst.msk [vmem:[%s1551_s18 + $0x38] sm:$0xff] %vm802_vm3, %v767_v30 }
 0x2b7   : > { %808 = vst.msk [vmem:[%s1551_s18 + $0x28] sm:$0xff] %vm802_vm3, %v759_v32 }
 0x2b9   : > { %v1234_v33 = vpop.f32.mrb[16].mxu0 }
 0x2ba   : > { %v780_v34 = vadd.f32 %v1234_v33, %v1122_v16  ;;  %v771_v35 = vpop.f32.mrb[17].mxu0 }
 0x2bb   : > { %v772_v36 = vadd.f32 %v1122_v16, %v771_v35  ;;  %v1235_v37 = vpop.f32.mrb[18].mxu0 }
 0x2bc   : > { %813 = vst.msk [vmem:[%s1551_s18 + $0x50] sm:$0xff] %vm802_vm3, %v780_v34  ;;  %v783_v38 = vadd.f32 %v1235_v37, %v1122_v16  ;;  %v774_v39 = vpop.f32.mrb[19].mxu0 }
 0x2bd   : > { %811 = vst.msk [vmem:[%s1551_s18 + $0x40] sm:$0xff] %vm802_vm3, %v772_v36  ;;  %v775_v40 = vadd.f32 %v1122_v16, %v774_v39 }
 0x2be   : > { %814 = vst.msk [vmem:[%s1551_s18 + $0x58] sm:$0xff] %vm802_vm3, %v783_v38 }
 0x2bf   : > { %812 = vst.msk [vmem:[%s1551_s18 + $0x48] sm:$0xff] %vm802_vm3, %v775_v40 }
 0x2c1   : > { %v1238_v41 = vpop.f32.mrb[20].mxu0  ;;  %825 = sbr.rel (!%p1490_p4) target bundleno = 761 (0x2f9), region = 52 }
 0x2c2   : > { %v796_v42 = vadd.f32 %v1238_v41, %v1122_v16  ;;  %v787_v43 = vpop.f32.mrb[21].mxu0 }
 0x2c3   : > { %v788_v44 = vadd.f32 %v1122_v16, %v787_v43  ;;  %v1239_v45 = vpop.f32.mrb[22].mxu0 }
 0x2c4   : > { %817 = vst.msk [vmem:[%s1551_s18 + $0x70] sm:$0xff] %vm802_vm3, %v796_v42  ;;  %v799_v46 = vadd.f32 %v1239_v45, %v1122_v16  ;;  %v790_v47 = vpop.f32.mrb[23].mxu0 }
 0x2c5   : > { %815 = vst.msk [vmem:[%s1551_s18 + $0x60] sm:$0xff] %vm802_vm3, %v788_v44  ;;  %v791_v48 = vadd.f32 %v1122_v16, %v790_v47 }
 0x2c6   : > { %818 = vst.msk [vmem:[%s1551_s18 + $0x78] sm:$0xff] %vm802_vm3, %v799_v46 }
 0x2c7   : > { %816 = vst.msk [vmem:[%s1551_s18 + $0x68] sm:$0xff] %vm802_vm3, %v791_v48 }
 0x2c8   : > { %s1701_s24 = smov (!%p828_p8, %s827_s24), 16 }
 0x2c9   : > { %s1135_s23 = sshll.u32 %s1701_s24, 7 }
 0x2ca   : > { %p1138_p9 = scmp.eq.s32.totalorder %s1135_s23, 0 }
 0x2cb   : > { %s1598_s26 = sshrl.u32 (!%p1138_p9), %s1701_s24, 4 }
 0x2cc   : > { %836 = sbr.rel (%p1138_p9) target bundleno = 761 (0x2f9), region = 56  ;;  %p1139_p10 = scmp.le.s32.totalorder (!%p1138_p9), %s1598_s26, 0 }
 0x2d3   : > { %1050 = sbr.rel (%p1139_p10) target bundleno = 740 (0x2e4), region = 132  ;;  %s1694_s27 = smov (!%p1139_p10), %s1592_s22 }
 0x2d4   : > { %s1695_s9 = smov (!%p1139_p10), %s1551_s18  ;;  %s1607_s12 = smov (!%p1139_p10), 0  }
 0x2d5   : > { %s1609_s29 = smov (!%p1139_p10), 0  }
 0x2da LB: >> { %v928_v49 = vld [vmem:[%s1399_s9] sm:$0xff]  ;;  %v930_v50 = vld [vmem:[%s1399_s9 + $0x8] sm:$0xff]  ;;  %v932_v51 = vld [vmem:[%s1399_s9 + $0x10] sm:$0xff]  ;;  %s960_s30 = sadd.s32 1, %s1403_s12  ;;  %s922_s29 = sadd.s32 1, %s1407_s29   ;;  %s1407_s29 = sphi %s1609_s29, %s922_s29   ;;  %s1403_s12 = sphi %s1607_s12, %s1696_s12   ;;  %s1399_s9 = sphi %s1695_s9, %s965_s9   ;;  %s1395_s27 = sphi %s1694_s27, %s966_s27  }
 0x2db   : >> { %929 = vst [vmem:[%s1395_s27] sm:$0xff] %v928_v49  ;;  %931 = vst [vmem:[%s1395_s27 + $0x8] sm:$0xff] %v930_v50  ;;  %v934_v52 = vld [vmem:[%s1399_s9 + $0x18] sm:$0xff]  ;;  %v936_v53 = vld [vmem:[%s1399_s9 + $0x20] sm:$0xff]  ;;  %p961_p11 = scmp.ge.s32.totalorder %s960_s30, %s1598_s26  ;;  %p921_p12 = scmp.ge.s32.totalorder %s922_s29, %s1598_s26 }
 0x2dc   : >> { %933 = vst [vmem:[%s1395_s27 + $0x10] sm:$0xff] %v932_v51  ;;  %v938_v54 = vld [vmem:[%s1399_s9 + $0x28] sm:$0xff]  ;;  %935 = vst [vmem:[%s1395_s27 + $0x18] sm:$0xff] %v934_v52  ;;  %v940_v55 = vld [vmem:[%s1399_s9 + $0x30] sm:$0xff] }
 0x2dd   : >> { %937 = vst [vmem:[%s1395_s27 + $0x20] sm:$0xff] %v936_v53  ;;  %939 = vst [vmem:[%s1395_s27 + $0x28] sm:$0xff] %v938_v54  ;;  %v942_v56 = vld [vmem:[%s1399_s9 + $0x38] sm:$0xff]  ;;  %v944_v57 = vld [vmem:[%s1399_s9 + $0x40] sm:$0xff]  ;;  %s1703_s30 = smov (%p961_p11, %s960_s30), 0  ;;  %924 = sbr.rel (!%p921_p12) target bundleno = 730 (0x2da), region = 138 }
 0x2de   : >> { %941 = vst [vmem:[%s1395_s27 + $0x30] sm:$0xff] %v940_v55  ;;  %943 = vst [vmem:[%s1395_s27 + $0x38] sm:$0xff] %v942_v56  ;;  %v946_v58 = vld [vmem:[%s1399_s9 + $0x48] sm:$0xff]  ;;  %v948_v59 = vld [vmem:[%s1399_s9 + $0x50] sm:$0xff]  ;;  %s1140_s10 = sshll.u32 %s1703_s30, 7  ;;  %s1696_s12 = smov %s1703_s30 }
 0x2df   : >> { %945 = vst [vmem:[%s1395_s27 + $0x40] sm:$0xff] %v944_v57  ;;  %v950_v60 = vld [vmem:[%s1399_s9 + $0x58] sm:$0xff]  ;;  %947 = vst [vmem:[%s1395_s27 + $0x48] sm:$0xff] %v946_v58  ;;  %v952_v61 = vld [vmem:[%s1399_s9 + $0x60] sm:$0xff] }
 0x2e0   : >> { %949 = vst [vmem:[%s1395_s27 + $0x50] sm:$0xff] %v948_v59  ;;  %951 = vst [vmem:[%s1395_s27 + $0x58] sm:$0xff] %v950_v60  ;;  %v954_v62 = vld [vmem:[%s1399_s9 + $0x68] sm:$0xff]  ;;  %v956_v63 = vld [vmem:[%s1399_s9 + $0x70] sm:$0xff] }
 0x2e1   : >> { %953 = vst [vmem:[%s1395_s27 + $0x60] sm:$0xff] %v952_v61  ;;  %955 = vst [vmem:[%s1395_s27 + $0x68] sm:$0xff] %v954_v62  ;;  %v958_v0 = vld [vmem:[%s1399_s9 + $0x78] sm:$0xff]  ;;  %s965_s9 = scalar_lea.vmem %s1551_s18, %s1140_s10 [#allocation2]  }
 0x2e2   : >> { %957 = vst [vmem:[%s1395_s27 + $0x70] sm:$0xff] %v956_v63  ;;  %959 = vst [vmem:[%s1395_s27 + $0x78] sm:$0xff] %v958_v0  ;;  %s966_s27 = scalar_lea.vmem %s1592_s22, %s1140_s10  }
 0x2e4 PF: > { %s1667_s11 = sand.u32 15, %s1701_s24   ;;  %s1151_s13 = sshll.u32 %s1598_s26, 7 }
 0x2e5   : > { %s971_s14 = scalar_lea.vmem %s1551_s18, %s1151_s13 [#allocation2]   ;;  %s973_s15 = scalar_lea.vmem %s1592_s22, %s1151_s13  }
 0x2e6   : > { %p1145_p13 = scmp.le.s32.totalorder %s1667_s11, 0 }
 0x2e7   : > { %s1409_s16 = smov (!%p1145_p13), %s973_s15   ;;  %s1413_s17 = smov (!%p1145_p13), %s971_s14  }
 0x2e8   : > { %1064 = sbr.rel (%p1145_p13) target bundleno = 761 (0x2f9), region = 143  ;;  %s1417_s19 = smov (!%p1145_p13), 0  }
 0x2e9   : > { %s1421_s20 = smov (!%p1145_p13), 0  }
 0x2ef LB: >> { %v983_v1 = vld [vmem:[%s1415_s17] sm:$0xff]  ;;  %s985_s24 = sadd.s32 1, %s1419_s19  ;;  %s977_s20 = sadd.s32 1, %s1423_s20   ;;  %s1423_s20 = sphi %s1421_s20, %s977_s20   ;;  %s1419_s19 = sphi %s1417_s19, %s1418_s19   ;;  %s1415_s17 = sphi %s1413_s17, %s990_s17   ;;  %s1411_s16 = sphi %s1409_s16, %s991_s16  }
 0x2f0   : >> { %984 = vst [vmem:[%s1411_s16] sm:$0xff] %v983_v1  ;;  %p986_p0 = scmp.ge.s32.totalorder %s985_s24, %s1667_s11  ;;  %p976_p1 = scmp.ge.s32.totalorder %s977_s20, %s1667_s11 }
 0x2f2   : >> { %s1705_s24 = smov (%p986_p0, %s985_s24), 0  ;;  %979 = sbr.rel (!%p976_p1) target bundleno = 751 (0x2ef), region = 149 }
 0x2f3   : >> { %s1146_s18 = sshll.u32 %s1705_s24, 3  ;;  %s1418_s19 = smov %s1705_s24  }
 0x2f4   : >> { %s990_s17 = scalar_lea.vmem %s971_s14, %s1146_s18 [#allocation2]   ;;  %s991_s16 = scalar_lea.vmem %s973_s15, %s1146_s18  }
 0x2f9 PF: > { %p14_p2 = scmp.ge.s32.totalorder %s1480_s28, 4   ;;  %s1697_s24 = smov %s1387_s25 }
 0x2fa   : > { %s1698_s25 = smov %s1488_s8  ;;  %s1699_s26 = smov %s1480_s28 }
 0x2fb   :  { %16 = sbr.rel (!%p14_p2) target bundleno = 2 (0x2), region = 160 }

</bundles_post_ra>
